<compile_context>
chip_gen: v7x
topology: tpu7x:2x2x1
jax: 0.10.0
libtpu: 0.0.40
codegen_flags: <defaults>
</compile_context>

<pallas_src>
import jax
import jax.numpy as jnp
from jax.experimental import pallas as pl
from jax.experimental.pallas import tpu as pltpu


def _patch_embed_kernel(p_ref, w_ref, b_ref, o_ref):
    # (tm, K_pad) @ (K_pad, tn) on the MXU with f32 accumulation, then bias add.
    acc = jnp.dot(p_ref[...], w_ref[...], preferred_element_type=jnp.float32)
    o_ref[...] = (acc + b_ref[...]).astype(o_ref.dtype)


def _round_up(x, m):
    return (x + m - 1) // m * m


def _vmem_budget_bytes():
    # Per-generation tile budget: ~48 MiB on 128-MiB-VMEM parts (v5e/v6e),
    # ~24 MiB on v7x (64 MiB physical / 32 MiB scoped default).
    try:
        cap = pltpu.get_tpu_info().vmem_capacity_bytes
    except Exception:
        cap = 64 << 20  # conservative fallback
    budget = min(max(cap // 2 - (8 << 20), 16 << 20), 48 << 20)
    return budget


def _select_tiles(M, K_pad, E_pad, cb, ob, budget):
    """Pick (tm, tn): full-E weight residency if it fits, then the largest tm."""
    # tn: keep the whole embed dim resident (weight fetched once) whenever the
    # double-buffered weight block fits in half the budget.
    tn_candidates = [E_pad] + [c for c in (2048, 1024, 512, 256, 128)
                               if c < E_pad and E_pad % c == 0]
    tn = tn_candidates[-1]
    for cand in tn_candidates:
        if 2 * K_pad * cand * cb <= budget // 2:
            tn = cand
            break
    w_bytes = 2 * K_pad * tn * cb + 2 * tn * 4  # weight + bias, double-buffered

    # tm: largest tile whose double-buffered patches + output blocks still fit.
    tm = 16
    for cand in (2048, 1024, 512, 256, 128, 64, 32, 16):
        if 2 * cand * (K_pad * cb + tn * ob) <= budget - w_bytes:
            tm = cand
            break
    # bf16 packs 16 sublanes per vreg: round small-M tiles to 16, not 8.
    tm = min(tm, _round_up(M, 16))
    return tm, tn


def patch_embedding(x, weight, bias, patch_size, *, compute_dtype=jnp.bfloat16,
                    out_dtype=None):
    """x: (B, C, H, W); weight: (E, C, P, P); bias: (E,). Returns (B, Np, E)."""
    if out_dtype is None:
        out_dtype = compute_dtype  # bf16 out: halves the largest HBM stream
    B, C, H, W = x.shape
    E = weight.shape[0]
    P = patch_size
    assert H % P == 0 and W % P == 0, "image size must be a multiple of patch_size"
    Hp, Wp = H // P, W // P
    Np = Hp * Wp
    K = C * P * P
    M = B * Np

    # --- glue: extract non-overlapping patches, flatten in (C, Ph, Pw) order.
    # Cast to bf16 first so the materialized relayout copy is half the bytes.
    # TODO(synk): fuse this relayout into the pallas_call input DMA.
    xc = x.astype(compute_dtype)
    patches = xc.reshape(B, C, Hp, P, Wp, P).transpose(0, 2, 4, 1, 3, 5)
    patches = patches.reshape(M, K)                            # (M, K)  bf16

    w_flat = weight.reshape(E, K).T.astype(compute_dtype)      # (K, E)  bf16
    b_flat = bias.reshape(1, E).astype(jnp.float32)            # (1, E)  f32

    # Lane-dense padding of K / E; skipped entirely when already aligned
    # (the standard ViT configs), so no extra HBM pass is spent on it.
    K_pad = _round_up(K, 128)
    E_pad = _round_up(E, 128)
    if K_pad != K:
        patches = jnp.pad(patches, ((0, 0), (0, K_pad - K)))
        w_flat = jnp.pad(w_flat, ((0, K_pad - K), (0, 0)))
    if E_pad != E:
        w_flat = jnp.pad(w_flat, ((0, 0), (0, E_pad - E)))
        b_flat = jnp.pad(b_flat, ((0, 0), (0, E_pad - E)))

    cb = jnp.dtype(compute_dtype).itemsize
    ob = jnp.dtype(out_dtype).itemsize
    budget = _vmem_budget_bytes()
    tm, tn = _select_tiles(M, K_pad, E_pad, cb, ob, budget)

    # Grid: E tiles outer (usually a single tile -> effectively 1-D over M),
    # M tiles inner so the weight block index is constant across consecutive
    # steps and its re-DMA is elided. Ragged M edge handled by cdiv + masked
    # partial last tile (no M padding, no output slice copy).
    grid = (E_pad // tn, pl.cdiv(M, tm))

    est_vmem = (2 * K_pad * tn * cb + 2 * tn * 4
                + 2 * tm * (K_pad * cb + tn * ob))
    vmem_limit = int(min(max(est_vmem + (16 << 20), 32 << 20), 48 << 20))

    cost = pl.CostEstimate(
        flops=2 * M * K_pad * E_pad,
        transcendentals=0,
        bytes_accessed=(M * K_pad * cb            # patches
                        + K_pad * E_pad * cb      # weight (fetched once)
                        + E_pad * 4               # bias
                        + M * E_pad * ob))        # output

    out = pl.pallas_call(
        _patch_embed_kernel,
        out_shape=jax.ShapeDtypeStruct((M, E_pad), out_dtype),
        grid=grid,
        in_specs=[
            pl.BlockSpec((tm, K_pad), lambda j, i: (i, 0)),   # patches (streamed)
            pl.BlockSpec((K_pad, tn), lambda j, i: (0, j)),   # weight (resident)
            pl.BlockSpec((1, tn), lambda j, i: (0, j)),       # bias (resident)
        ],
        out_specs=pl.BlockSpec((tm, tn), lambda j, i: (i, j)),
        compiler_params=pltpu.CompilerParams(
            dimension_semantics=("parallel", "parallel"),
            vmem_limit_bytes=vmem_limit,
        ),
        cost_estimate=cost,
    )(patches, w_flat, b_flat)

    if E_pad != E:
        out = out[:, :E]
    return out.reshape(B, Np, E)


if __name__ == "__main__":
    # Small, forward-consistent shapes: img_size=16, patch_size=4,
    # in_channels=4, embed_dim=32  ->  num_patches = (16//4)**2 = 16.
    B, C, IMG, P, E = 2, 4, 16, 4, 32

    key = jax.random.PRNGKey(0)
    kx, kw, kb = jax.random.split(key, 3)
    x = jax.random.normal(kx, (B, C, IMG, IMG), dtype=jnp.float32)
    weight = jax.random.normal(kw, (E, C, P, P), dtype=jnp.float32) * 0.02
    bias = jax.random.normal(kb, (E,), dtype=jnp.float32) * 0.02

    out = patch_embedding(x, weight, bias, P)
    out = jax.block_until_ready(out)

    # Reference check against a plain-JAX (f32) conv-as-matmul formulation.
    Hp = Wp = IMG // P
    ref_patches = x.reshape(B, C, Hp, P, Wp, P).transpose(0, 2, 4, 1, 3, 5)
    ref_patches = ref_patches.reshape(B, Hp * Wp, C * P * P)
    ref = jnp.einsum("bnk,ke->bne", ref_patches, weight.reshape(E, -1).T) + bias

    assert out.shape == (B, (IMG // P) ** 2, E)
    # bf16 matmul inputs + bf16 output with f32 accumulation -> loose tolerance.
    assert jnp.allclose(out.astype(jnp.float32), ref, atol=2e-2, rtol=2e-2), (
        float(jnp.max(jnp.abs(out.astype(jnp.float32) - ref))))

    print("KERNEL_OK")
</pallas_src>

<mosaic_0001>
module attributes {stable_mosaic.version = 11 : i64} {
  func.func @_patch_embed_kernel(%arg0: i32, %arg1: i32, %arg2: memref<32x128xbf16, #tpu.memory_space<vmem>>, %arg3: memref<128x128xbf16, #tpu.memory_space<vmem>>, %arg4: memref<1x128xf32, #tpu.memory_space<vmem>>, %arg5: memref<32x128xbf16, #tpu.memory_space<vmem>>) attributes {dimension_semantics = [#tpu.dimension_semantics<parallel>, #tpu.dimension_semantics<parallel>], iteration_bounds = array<i64: 1, 1>, scalar_prefetch = 0 : i64, scratch_operands = 0 : i64, tpu.core_type = #tpu.core_type<tc>, window_params = [{transform_indices = @transform_0, window_bounds = array<i64: 32, 128>}, {transform_indices = @transform_1, window_bounds = array<i64: 128, 128>}, {transform_indices = @transform_2, window_bounds = array<i64: 1, 128>}, {transform_indices = @transform_3, window_bounds = array<i64: 32, 128>}]} {
    %c0 = arith.constant 0 : index
    %c0_0 = arith.constant 0 : index
    %0 = vector.load %arg2[%c0, %c0_0] : memref<32x128xbf16, #tpu.memory_space<vmem>>, vector<32x128xbf16>
    %c0_1 = arith.constant 0 : index
    %c0_2 = arith.constant 0 : index
    %1 = vector.load %arg3[%c0_1, %c0_2] : memref<128x128xbf16, #tpu.memory_space<vmem>>, vector<128x128xbf16>
    %cst = arith.constant dense<0.000000e+00> : vector<32x128xf32>
    %2 = tpu.matmul %0, %1, %cst {dimension_numbers = #tpu.dot_dimension_numbers<[1], [0], [0], [1], [0, 0, 1, 1], [], []>} : vector<32x128xbf16>, vector<128x128xbf16>, vector<32x128xf32> -> vector<32x128xf32>
    %c0_3 = arith.constant 0 : index
    %c0_4 = arith.constant 0 : index
    %3 = vector.load %arg4[%c0_3, %c0_4] : memref<1x128xf32, #tpu.memory_space<vmem>>, vector<1x128xf32>
    %4 = vector.broadcast %3 : vector<1x128xf32> to vector<32x128xf32>
    %5 = arith.addf %2, %4 : vector<32x128xf32>
    %6 = arith.truncf %5 : vector<32x128xf32> to vector<32x128xbf16>
    %c0_5 = arith.constant 0 : index
    %c0_6 = arith.constant 0 : index
    %7 = vector.load %arg5[%c0_5, %c0_6] : memref<32x128xbf16, #tpu.memory_space<vmem>>, vector<32x128xbf16>
    tpu.vector_store %arg5[%c0_5, %c0_6], %6 {strides = array<i32>} : memref<32x128xbf16, #tpu.memory_space<vmem>>, vector<32x128xbf16>,
    return
  }
  func.func @transform_0(%arg0: i32, %arg1: i32) -> (i32, i32) {
    %c0_i32 = arith.constant 0 : i32
    %c0_i32_0 = arith.constant 0 : i32
    return %arg1, %c0_i32 : i32, i32
  }
  func.func @transform_1(%arg0: i32, %arg1: i32) -> (i32, i32) {
    %c0_i32 = arith.constant 0 : i32
    %c0_i32_0 = arith.constant 0 : i32
    return %c0_i32, %arg0 : i32, i32
  }
  func.func @transform_2(%arg0: i32, %arg1: i32) -> (i32, i32) {
    %c0_i32 = arith.constant 0 : i32
    %c0_i32_0 = arith.constant 0 : i32
    return %c0_i32, %arg0 : i32, i32
  }
  func.func @transform_3(%arg0: i32, %arg1: i32) -> (i32, i32) {
    %c0_i32 = arith.constant 0 : i32
    return %arg1, %arg0 : i32, i32
  }
}

</mosaic_0001>

<bundles_post_ra>
// kernel: tpu_custom_call.1
= control target key start
LH: loop header
LB: loop body
LE: loop exit
PB: predicated region body
PF: predicated region fallthrough
CT: control target
= control target key end

     0   :  { %8 = vsyncpa [#allocation3], 0  ;;  %s438_s0 = inlined_call_operand.hbm [shape: bf16[32,128], index: 0, kind: input, shape index: {}]   ;;  %s439_s1 = inlined_call_operand.hbm [shape: bf16[128,128], index: 1, kind: input, shape index: {}]   ;;  %s440_s2 = inlined_call_operand.vmem [shape: f32[1,128], index: 2, kind: input, shape index: {}]   ;;  %s441_s3 = inlined_call_operand.hbm [shape: bf16[32,128], index: 3, kind: output, shape index: {}]  }
   0x1   :  { %9 = vsyncpa [#allocation6], 0 }
   0x2   :  { %10 = vsyncpa [#allocation4], 0  ;;  %s365_s12 = smov [#allocation2]   ;;  %s293_s16 = scalar_lea.hbm %s438_s0, 256 }
   0x3   :  { %s16_s13 = sshll.u32 %s365_s12, 4  ;;  %p294_p0 = scmp.ne.s32.totalorder %s438_s0, %s293_s16  ;;  %s17_s13 = int_to_ptr.vmem [resolvable:$true] %s16_s13 }
   0x4   :  { %p297_p1 = scmp.lt.u32.totalorder %s293_s16, %s438_s0 }
   0x6   :  { %p299_p2 = pnand %p297_p1, %p294_p0 }
   0x8   :  { %302 = shalt.err (!%p299_p2)
}
   0x9   :  { %s303_s21 = scalar_lea.vmem %s17_s13, 256  ;;  %p308_p4 = scmp.lt.s32.totalorder %s17_s13, %s17_s13 }
   0xa   :  { %p304_p3 = scmp.ne.s32.totalorder %s17_s13, %s303_s21  ;;  %p309_p5 = scmp.lt.s32.totalorder %s303_s21, %s303_s21 }
   0xc   :  { %p310_p6 = por %p309_p5, %p308_p4 }
   0xe   :  { %p311_p7 = pnand %p310_p6, %p304_p3 }
  0x10   :  { %314 = shalt.err (!%p311_p7)
}
  0x11   :  { %s366_s22 = smov 64   ;;  %s367_s23 = smov 4  }
  0x12   :  { %22 = dma.hbm_to_vmem [thread:$0]  %s438_s0, 256, %s17_s13, [#allocation3], %s366_s22, %s366_s22, %s367_s23  }
  0x13   :  { %s368_s26 = smov [#allocation5]   ;;  %s315_s30 = scalar_lea.hbm %s439_s1, 1024 }
  0x14   :  { %s28_s27 = sshll.u32 %s368_s26, 4  ;;  %p316_p8 = scmp.ne.s32.totalorder %s439_s1, %s315_s30  ;;  %s29_s27 = int_to_ptr.vmem [resolvable:$true] %s28_s27 }
  0x15   :  { %p319_p9 = scmp.lt.u32.totalorder %s315_s30, %s439_s1 }
  0x17   :  { %p321_p10 = pnand %p319_p9, %p316_p8 }
  0x19   :  { %324 = shalt.err (!%p321_p10)
}
  0x1a   :  { %s325_s8 = scalar_lea.vmem %s29_s27, 1024  ;;  %p330_p12 = scmp.lt.s32.totalorder %s29_s27, %s29_s27 }
  0x1b   :  { %p326_p11 = scmp.ne.s32.totalorder %s29_s27, %s325_s8  ;;  %p331_p13 = scmp.lt.s32.totalorder %s325_s8, %s325_s8 }
  0x1d   :  { %p332_p0 = por %p331_p13, %p330_p12 }
  0x1f   :  { %p333_p1 = pnand %p332_p0, %p326_p11 }
  0x21   :  { %336 = shalt.err (!%p333_p1)
}
  0x22   :  { %34 = dma.hbm_to_vmem [thread:$0]  %s439_s1, 1024, %s29_s27, [#allocation6], %s366_s22, %s366_s22, %s367_s23  }
  0x23   :  { %359 = dma.done.wait [#allocation3], 256  }
  0x24   :  { %360 = vsyncadd [#allocation3], 4294967040 }
  0x25   :  { %361 = dma.done.wait [#allocation6], 1024  }
  0x26   :  { %362 = vsyncadd [#allocation6], 4294966272  ;;  %v283_v0 = vld [vmem:[#allocation5] sm:$0xff]   ;;  %v284_v1 = vld [vmem:[#allocation5 + $0x8] sm:$0xff]   ;;  %s369_s11 = smov [#allocation7]  }
  0x27   :  { %258 = vmatprep.subr.bf16.mxu0 %v283_v0  ;;  %v285_v2 = vld [vmem:[#allocation5 + $0x10] sm:$0xff]   ;;  %v286_v3 = vld [vmem:[#allocation5 + $0x18] sm:$0xff]   ;;  %v287_v5 = vld [vmem:[#allocation5 + $0x20] sm:$0xff]   ;;  %s205_s12 = sshll.u32 %s369_s11, 4  ;;  %s206_s12 = int_to_ptr.vmem [resolvable:$true] %s205_s12 }
  0x28   :  { %259 = vmatpush3.bf16.msra.mxu0 %v283_v0  ;;  %v291_v4 = vld [vmem:[#allocation2] sm:$0xff]   ;;  %v288_v6 = vld [vmem:[#allocation5 + $0x28] sm:$0xff]   ;;  %v290_v8 = vld [vmem:[#allocation5 + $0x38] sm:$0xff]   ;;  %s337_s13 = scalar_lea.vmem %s206_s12, 256  ;;  %p342_p3 = scmp.lt.s32.totalorder %s206_s12, %s206_s12 }
  0x29   :  { %260 = vmatprep.subr.bf16.mxu0 %v284_v1  ;;  %274 = vmatprep.mubr.bf16.mxu0 %v291_v4  ;;  %v289_v7 = vld [vmem:[#allocation5 + $0x30] sm:$0xff]   ;;  %v292_v9 = vld [vmem:[#allocation2 + $0x8] sm:$0xff]   ;;  %p338_p2 = scmp.ne.s32.totalorder %s206_s12, %s337_s13  ;;  %p343_p4 = scmp.lt.s32.totalorder %s337_s13, %s337_s13 }
  0x2a   :  { %v218_v11 = vld [vmem:[%s440_s2] ss:$0 sm:$0xff] }
  0x2b   :  { %p344_p5 = por %p343_p4, %p342_p3 }
  0x2c   :  { %261 = vmatpush3.bf16.msra.mxu0 %v284_v1 }
  0x2d   :  { %262 = vmatprep.subr.bf16.mxu0 %v285_v2  ;;  %p345_p6 = pnand %p344_p5, %p338_p2 }
  0x30   :  { %263 = vmatpush3.bf16.msra.mxu0 %v285_v2 }
  0x31   :  { %264 = vmatprep.subr.bf16.mxu0 %v286_v3 }
  0x34   :  { %265 = vmatpush3.bf16.msra.mxu0 %v286_v3 }
  0x35   :  { %266 = vmatprep.subr.bf16.mxu0 %v287_v5 }
  0x38   :  { %267 = vmatpush3.bf16.msra.mxu0 %v287_v5 }
  0x39   :  { %268 = vmatprep.subr.bf16.mxu0 %v288_v6 }
  0x3c   :  { %269 = vmatpush3.bf16.msra.mxu0 %v288_v6 }
  0x3d   :  { %270 = vmatprep.subr.bf16.mxu0 %v289_v7 }
  0x40   :  { %271 = vmatpush3.bf16.msra.mxu0 %v289_v7 }
  0x41   :  { %272 = vmatprep.subr.bf16.mxu0 %v290_v8 }
  0x44   :  { %273 = vmatpush3.bf16.msra.mxu0 %v290_v8 }
  0x47   :  { %275 = vmatmul.mubr.bf16.vlgmr.msra.gmra.mrb[0].mxu0 %v292_v9 }
 0x11a   :  { %v276_v10 = vpop.f32.mrb[0].mxu0 }
 0x11b   :  { %v165_v12 = vpop.f32.mrb[1].mxu0  ;;  %v174_v14 = vadd.f32 %v276_v10, %v218_v11 }
 0x11c   :  { %v277_v13 = vpop.f32.mrb[2].mxu0  ;;  %v166_v17 = vadd.f32 %v218_v11, %v165_v12 }
 0x11d   :  { %v177_v15 = vadd.f32 %v277_v13, %v218_v11  ;;  %v168_v16 = vpop.f32.mrb[3].mxu0 }
 0x11e   :  { %v169_v18 = vadd.f32 %v218_v11, %v168_v16 }
 0x11f   :  { %v245_v19 = vpack.c.bf16 %v177_v15, %v174_v14 }
 0x120   :  { %v240_v20 = vpack.c.bf16 %v169_v18, %v166_v17 }
 0x121   :  { %247 = vst [vmem:[#allocation7 + $0x8] sm:$0xff] %v245_v19  }
 0x122   :  { %241 = vst [vmem:[#allocation7] sm:$0xff] %v240_v20  }
 0x123   :  { %348 = shalt.err (!%p345_p6)
}
 0x124   :  { %s349_s15 = scalar_lea.hbm %s441_s3, 256 }
 0x125   :  { %p350_p7 = scmp.ne.s32.totalorder %s441_s3, %s349_s15  ;;  %p353_p8 = scmp.lt.u32.totalorder %s349_s15, %s441_s3 }
 0x127   :  { %p355_p9 = pnand %p353_p8, %p350_p7 }
 0x129   :  { %358 = shalt.err (!%p355_p9)
}
 0x12a   :  { %211 = dma.vmem_to_hbm [thread:$0]  %s206_s12, 256, %s441_s3, [#allocation4], %s366_s22, %s366_s22, %s367_s23  }
 0x12b   :  { %363 = dma.done.wait [#allocation4], 256  }
 0x12c   :  { %364 = vsyncadd [#allocation4], 4294967040 }
 0x12d   :  { %215 = vsyncpa [#allocation3], 1 }
 0x12e   :  { %216 = vsyncpa [#allocation6], 1 }
 0x12f   :  { %217 = vsyncpa [#allocation4], 1 }

</bundles_post_ra>
